<compile_context>
chip_gen: v6e
topology: v6e:2x2x1
jax: 0.10.0
libtpu: 0.0.40
codegen_flags: <defaults>
</compile_context>

<pallas_src>
import functools

import jax
import jax.numpy as jnp
from jax.experimental import pallas as pl
from jax.experimental.pallas import tpu as pltpu


def _pool_quant_kernel(x_ref, m_ref, o_ref, *, scale: float):
    # x_ref: (blk, H*W)    lane-dense input block (one (n, c) slice per row)
    # m_ref: (H*W, oh*ow)  static 0/1 block-diagonal pooling matrix (resident)
    # o_ref: (blk, oh*ow)  lane-dense output block (256 lanes for (16, 16))
    pooled = jnp.dot(x_ref[...], m_ref[...],
                     preferred_element_type=jnp.float32)      # MXU, full width
    # scale = 255 / (kh*kw): the window average is folded into the quant scale.
    o_ref[...] = (jnp.round(pooled * scale) / 255.0).astype(o_ref.dtype)


def _round_up(v: int, m: int) -> int:
    return -(-v // m) * m


def hierarchical_quantizer(x: jax.Array, output_size=(16, 16)) -> jax.Array:
    """x: (N, C, H, W). Returns round(adaptive_avg_pool2d(x, output_size) * 255) / 255."""
    n, c, h, w = x.shape
    oh, ow = output_size
    # TODO(synk): general (non-divisible) adaptive pooling needs variable-size
    # windows (floor/ceil boundaries) and is not implemented.
    assert h % oh == 0 and w % ow == 0, "only divisible adaptive pooling supported"
    kh, kw = h // oh, w // ow
    nc, hw, ohw = n * c, h * w, oh * ow
    itemsize = jnp.dtype(x.dtype).itemsize

    # Pure reshape (free, no HBM transpose/copy pass): (N, C, H, W) -> (N*C, H*W).
    xr = x.reshape(nc, hw)

    # Static 0/1 pooling matrix: M[r*W + s, p*ow + q] = 1 iff r//kh == p and s//kw == q.
    # TODO(synk): for very large H*W the dense pooling matrix no longer fits in
    # VMEM; a band-wise pooling form with a second "arbitrary" grid axis would
    # be needed there.
    rr = jnp.arange(hw) // w
    cc = jnp.arange(hw) % w
    dest = (rr // kh) * ow + (cc // kw)                                 # (H*W,)
    m = (dest[:, None] == jnp.arange(ohw)[None, :]).astype(x.dtype)     # (H*W, oh*ow)

    # ---- block-size selection --------------------------------------------
    def vmem_footprint(b: int) -> int:
        # double-buffered input + double-buffered output + resident M,
        # accounting for (8, 128) tile padding.
        in_b = _round_up(b, 8) * _round_up(hw, 128) * itemsize * 2
        out_b = _round_up(b, 8) * _round_up(ohw, 128) * itemsize * 2
        m_b = _round_up(hw, 8) * _round_up(ohw, 128) * itemsize
        return in_b + out_b + m_b

    budget = 40 * 1024 * 1024            # safe inside v7x's 64 MiB physical VMEM
    target_in = 8 * 1024 * 1024          # ~8 MiB of input per grid step
    b_cap = max(8, (target_in // max(hw * itemsize, 1)) // 8 * 8)
    while b_cap > 8 and vmem_footprint(b_cap) > budget:
        b_cap -= 8

    blk = min(nc, b_cap)
    if blk == nc and nc >= 16 and nc % 16 == 0:
        # Keep >= 2 grid steps so the "parallel" axis can shard across v7x's
        # two TensorCores (no effect on single-TC v5e/v6e).
        blk = nc // 2
    grid = (pl.cdiv(nc, blk),)

    vmem_limit = int(min(max(vmem_footprint(blk) + (4 << 20), 32 << 20), 100 << 20))

    out = pl.pallas_call(
        functools.partial(_pool_quant_kernel, scale=255.0 / float(kh * kw)),
        out_shape=jax.ShapeDtypeStruct((nc, ohw), x.dtype),
        grid=grid,
        in_specs=[
            pl.BlockSpec((blk, hw), lambda i: (i, 0)),    # streamed input block
            pl.BlockSpec((hw, ohw), lambda i: (0, 0)),    # resident pooling matrix
        ],
        out_specs=pl.BlockSpec((blk, ohw), lambda i: (i, 0)),
        compiler_params=pltpu.CompilerParams(
            dimension_semantics=("parallel",),
            vmem_limit_bytes=vmem_limit,
        ),
    )(xr, m)

    # (N*C, oh*ow) has the same memory layout as (N, C, oh, ow): free reshape.
    return out.reshape(n, c, oh, ow)


def _reference(x, output_size=(16, 16)):
    n, c, h, w = x.shape
    oh, ow = output_size
    kh, kw = h // oh, w // ow
    pooled = x.reshape(n, c, oh, kh, ow, kw).mean(axis=(3, 5))
    return jnp.round(pooled * 255.0) / 255.0


if __name__ == "__main__":
    key = jax.random.PRNGKey(0)
    # 8-bit-like image values on a 1/256 grid: window sums (and sum * 255/(kh*kw))
    # are exact in float32, so the MXU pooling path matches the reference even at
    # round-half-even .5 ties.
    x = jnp.floor(jax.random.uniform(key, (2, 4, 32, 32), dtype=jnp.float32) * 256.0) / 256.0

    y = hierarchical_quantizer(x, output_size=(16, 16))
    y = jax.block_until_ready(y)

    y_ref = _reference(x, output_size=(16, 16))
    assert y.shape == (2, 4, 16, 16), y.shape
    assert jnp.allclose(y, y_ref, atol=1e-6), "mismatch vs reference"

    print("KERNEL_OK")
</pallas_src>

<mosaic_0001>
module attributes {stable_mosaic.version = 11 : i64} {
  func.func @_pool_quant_kernel(%arg0: i32, %arg1: memref<8x1024xf32, #tpu.memory_space<vmem>>, %arg2: memref<1024x256xf32, #tpu.memory_space<vmem>>, %arg3: memref<8x256xf32, #tpu.memory_space<vmem>>) attributes {dimension_semantics = [#tpu.dimension_semantics<parallel>], iteration_bounds = array<i64: 1>, scalar_prefetch = 0 : i64, scratch_operands = 0 : i64, tpu.core_type = #tpu.core_type<tc>, window_params = [{transform_indices = @transform_0, window_bounds = array<i64: 8, 1024>}, {pipeline_mode = #tpu.pipeline_mode<synchronous>, transform_indices = @transform_1, window_bounds = array<i64: 1024, 256>}, {transform_indices = @transform_2, window_bounds = array<i64: 8, 256>}]} {
    %c0 = arith.constant 0 : index
    %c0_0 = arith.constant 0 : index
    %0 = vector.load %arg1[%c0, %c0_0] : memref<8x1024xf32, #tpu.memory_space<vmem>>, vector<8x1024xf32>
    %c0_1 = arith.constant 0 : index
    %c0_2 = arith.constant 0 : index
    %1 = vector.load %arg2[%c0_1, %c0_2] : memref<1024x256xf32, #tpu.memory_space<vmem>>, vector<1024x256xf32>
    %cst = arith.constant dense<0.000000e+00> : vector<8x256xf32>
    %2 = tpu.matmul %0, %1, %cst {dimension_numbers = #tpu.dot_dimension_numbers<[1], [0], [0], [1], [0, 0, 1, 1], [], []>} : vector<8x1024xf32>, vector<1024x256xf32>, vector<8x256xf32> -> vector<8x256xf32>
    %cst_3 = arith.constant 6.375000e+01 : f32
    %3 = vector.broadcast %cst_3 : f32 to vector<8x256xf32>
    %4 = arith.mulf %2, %3 : vector<8x256xf32>
    %5 = math.roundeven %4 : vector<8x256xf32>
    %cst_4 = arith.constant 2.550000e+02 : f32
    %6 = vector.broadcast %cst_4 : f32 to vector<8x256xf32>
    %7 = arith.divf %5, %6 : vector<8x256xf32>
    %c0_5 = arith.constant 0 : index
    %c0_6 = arith.constant 0 : index
    %8 = vector.load %arg3[%c0_5, %c0_6] : memref<8x256xf32, #tpu.memory_space<vmem>>, vector<8x256xf32>
    tpu.vector_store %arg3[%c0_5, %c0_6], %7 {strides = array<i32>} : memref<8x256xf32, #tpu.memory_space<vmem>>, vector<8x256xf32>,
    return
  }
  func.func @transform_0(%arg0: i32) -> (i32, i32) {
    %c0_i32 = arith.constant 0 : i32
    %c0_i32_0 = arith.constant 0 : i32
    return %arg0, %c0_i32 : i32, i32
  }
  func.func @transform_1(%arg0: i32) -> (i32, i32) {
    %c0_i32 = arith.constant 0 : i32
    %c0_i32_0 = arith.constant 0 : i32
    %c0_i32_1 = arith.constant 0 : i32
    return %c0_i32, %c0_i32_0 : i32, i32
  }
  func.func @transform_2(%arg0: i32) -> (i32, i32) {
    %c0_i32 = arith.constant 0 : i32
    %c0_i32_0 = arith.constant 0 : i32
    return %arg0, %c0_i32 : i32, i32
  }
}

</mosaic_0001>

<bundles_post_ra>
// kernel: tpu_custom_call.1
= control target key start
LH: loop header
LB: loop body
LE: loop exit
PB: predicated region body
PF: predicated region fallthrough
CT: control target
= control target key end

     0   :  { %7 = vsyncpa [#allocation3], 0  ;;  %s727_s0 = inlined_call_operand.hbm [shape: f32[8,1024], index: 0, kind: input, shape index: {}]   ;;  %s728_s1 = inlined_call_operand.hbm [shape: f32[1024,256], index: 1, kind: input, shape index: {}]   ;;  %s729_s2 = inlined_call_operand.hbm [shape: f32[8,256], index: 2, kind: output, shape index: {}]  }
   0x1   :  { %8 = vsyncpa [#allocation6], 0 }
   0x2   :  { %9 = vsyncpa [#allocation4], 0  ;;  %s698_s9 = smov [#allocation2]   ;;  %s699_s11 = smov [#allocation5]  }
   0x3   :  { %s16_s10 = sshll.u32 %s698_s9, 4  ;;  %s25_s12 = sshll.u32 %s699_s11, 4  ;;  %s17_s10 = int_to_ptr.vmem [resolvable:$true] %s16_s10  ;;  %s26_s12 = int_to_ptr.vmem [resolvable:$true] %s25_s12 }
   0x4   :  { %s640_s13 = scalar_lea.vmem %s17_s10, 1024  ;;  %p645_p1 = scmp.lt.s32.totalorder %s17_s10, %s17_s10 }
   0x5   :  { %p641_p0 = scmp.ne.s32.totalorder %s17_s10, %s640_s13  ;;  %p646_p2 = scmp.lt.s32.totalorder %s640_s13, %s640_s13 }
   0x7   :  { %p647_p3 = por %p646_p2, %p645_p1 }
   0x9   :  { %p648_p4 = pnand %p647_p3, %p641_p0 }
   0xb   :  { %651 = shalt.err (!%p648_p4)
}
   0xc   :  { %19 = dma.hbm_to_vmem [thread:$0]  %s727_s0, 1024, %s17_s10, [#allocation3]  }
   0xd   :  { %s660_s16 = scalar_lea.vmem %s26_s12, 32768  ;;  %p665_p6 = scmp.lt.s32.totalorder %s26_s12, %s26_s12 }
   0xe   :  { %p661_p5 = scmp.ne.s32.totalorder %s26_s12, %s660_s16  ;;  %p666_p7 = scmp.lt.s32.totalorder %s660_s16, %s660_s16 }
  0x10   :  { %p667_p8 = por %p666_p7, %p665_p6 }
  0x12   :  { %p668_p9 = pnand %p667_p8, %p661_p5 }
  0x14   :  { %671 = shalt.err (!%p668_p9)
}
  0x15   :  { %s700_s17 = smov 256   ;;  %s701_s18 = smov 16  }
  0x16   :  { %31 = dma.hbm_to_vmem [thread:$0]  %s728_s1, 32768, %s26_s12, [#allocation6], %s700_s17, %s700_s17, %s701_s18  }
  0x17   :  { %692 = dma.done.wait [#allocation3], 1024  }
  0x18   :  { %693 = vsyncadd [#allocation3], 4294966272 }
  0x19   :  { %694 = dma.done.wait [#allocation6], 32768  }
  0x1a   :  { %695 = vsyncadd [#allocation6], 4294934528  ;;  %v77_v0 = vld [vmem:[#allocation5 + $0xf8] sm:$0xff]  ;;  %v76_v2 = vld [vmem:[#allocation5 + $0xf0] sm:$0xff]  ;;  %s702_s0 = smov [#allocation7]  }
  0x1b   :  { %v141_v1 = vld [vmem:[#allocation5 + $0x2f8] sm:$0xff]  ;;  %302 = vmatprep.subr.mxu0 %v77_v0  ;;  %v140_v3 = vld [vmem:[#allocation5 + $0x2f0] sm:$0xff]  ;;  %v75_v4 = vld [vmem:[#allocation5 + $0xe8] sm:$0xff]  ;;  %s601_s1 = sshll.u32 %s702_s0, 4  ;;  %s602_s1 = int_to_ptr.vmem [resolvable:$true] %s601_s1 }
  0x1c   :  { %373 = vmatprep.subr.mxu1 %v141_v1  ;;  %v139_v5 = vld [vmem:[#allocation5 + $0x2e8] sm:$0xff]  ;;  %303 = vmatpush1.msra.mxu0 %v76_v2  ;;  %v74_v6 = vld [vmem:[#allocation5 + $0xe0] sm:$0xff]  ;;  %v73_v8 = vld [vmem:[#allocation5 + $0xd8] sm:$0xff]  ;;  %s672_s21 = scalar_lea.vmem %s602_s1, 256  ;;  %p677_p11 = scmp.lt.s32.totalorder %s602_s1, %s602_s1 }
  0x1d   :  { %374 = vmatpush1.msra.mxu1 %v140_v3  ;;  %v138_v7 = vld [vmem:[#allocation5 + $0x2e0] sm:$0xff]  ;;  %304 = vmatprep.subr.mxu0 %v75_v4  ;;  %v137_v9 = vld [vmem:[#allocation5 + $0x2d8] sm:$0xff]  ;;  %v72_v10 = vld [vmem:[#allocation5 + $0xd0] sm:$0xff]  ;;  %p673_p10 = scmp.ne.s32.totalorder %s602_s1, %s672_s21  ;;  %p678_p12 = scmp.lt.s32.totalorder %s672_s21, %s672_s21 }
  0x1e   :  { %375 = vmatprep.subr.mxu1 %v139_v5  ;;  %v136_v11 = vld [vmem:[#allocation5 + $0x2d0] sm:$0xff]  ;;  %305 = vmatpush1.msra.mxu0 %v74_v6  ;;  %v71_v12 = vld [vmem:[#allocation5 + $0xc8] sm:$0xff]  ;;  %v70_v14 = vld [vmem:[#allocation5 + $0xc0] sm:$0xff] }
  0x1f   :  { %376 = vmatpush1.msra.mxu1 %v138_v7  ;;  %v135_v13 = vld [vmem:[#allocation5 + $0x2c8] sm:$0xff]  ;;  %306 = vmatprep.subr.mxu0 %v73_v8  ;;  %v134_v15 = vld [vmem:[#allocation5 + $0x2c0] sm:$0xff]  ;;  %v69_v16 = vld [vmem:[#allocation5 + $0xb8] sm:$0xff]  ;;  %p679_p13 = por %p678_p12, %p677_p11 }
  0x20   :  { %377 = vmatprep.subr.mxu1 %v137_v9  ;;  %307 = vmatpush1.msra.mxu0 %v72_v10  ;;  %v133_v17 = vld [vmem:[#allocation5 + $0x2b8] sm:$0xff]  ;;  %v68_v18 = vld [vmem:[#allocation5 + $0xb0] sm:$0xff]  ;;  %v67_v20 = vld [vmem:[#allocation5 + $0xa8] sm:$0xff] }
  0x21   :  { %378 = vmatpush1.msra.mxu1 %v136_v11  ;;  %308 = vmatprep.subr.mxu0 %v71_v12  ;;  %v132_v19 = vld [vmem:[#allocation5 + $0x2b0] sm:$0xff]  ;;  %v131_v21 = vld [vmem:[#allocation5 + $0x2a8] sm:$0xff]  ;;  %v66_v22 = vld [vmem:[#allocation5 + $0xa0] sm:$0xff]  ;;  %p680_p0 = pnand %p679_p13, %p673_p10 }
  0x22   :  { %379 = vmatprep.subr.mxu1 %v135_v13  ;;  %309 = vmatpush1.msra.mxu0 %v70_v14  ;;  %v130_v23 = vld [vmem:[#allocation5 + $0x2a0] sm:$0xff]  ;;  %v65_v24 = vld [vmem:[#allocation5 + $0x98] sm:$0xff]  ;;  %v64_v26 = vld [vmem:[#allocation5 + $0x90] sm:$0xff] }
  0x23   :  { %380 = vmatpush1.msra.mxu1 %v134_v15  ;;  %310 = vmatprep.subr.mxu0 %v69_v16  ;;  %v129_v25 = vld [vmem:[#allocation5 + $0x298] sm:$0xff]  ;;  %v128_v27 = vld [vmem:[#allocation5 + $0x290] sm:$0xff]  ;;  %v63_v28 = vld [vmem:[#allocation5 + $0x88] sm:$0xff] }
  0x24   :  { %381 = vmatprep.subr.mxu1 %v133_v17  ;;  %311 = vmatpush1.msra.mxu0 %v68_v18  ;;  %v127_v29 = vld [vmem:[#allocation5 + $0x288] sm:$0xff]  ;;  %v62_v30 = vld [vmem:[#allocation5 + $0x80] sm:$0xff]  ;;  %v61_v32 = vld [vmem:[#allocation5 + $0x78] sm:$0xff] }
  0x25   :  { %382 = vmatpush1.msra.mxu1 %v132_v19  ;;  %312 = vmatprep.subr.mxu0 %v67_v20  ;;  %v126_v31 = vld [vmem:[#allocation5 + $0x280] sm:$0xff]  ;;  %v125_v33 = vld [vmem:[#allocation5 + $0x278] sm:$0xff]  ;;  %v60_v34 = vld [vmem:[#allocation5 + $0x70] sm:$0xff] }
  0x26   :  { %383 = vmatprep.subr.mxu1 %v131_v21  ;;  %313 = vmatpush1.msra.mxu0 %v66_v22  ;;  %v124_v35 = vld [vmem:[#allocation5 + $0x270] sm:$0xff]  ;;  %v59_v36 = vld [vmem:[#allocation5 + $0x68] sm:$0xff]  ;;  %v58_v38 = vld [vmem:[#allocation5 + $0x60] sm:$0xff] }
  0x27   :  { %384 = vmatpush1.msra.mxu1 %v130_v23  ;;  %314 = vmatprep.subr.mxu0 %v65_v24  ;;  %v123_v37 = vld [vmem:[#allocation5 + $0x268] sm:$0xff]  ;;  %v122_v39 = vld [vmem:[#allocation5 + $0x260] sm:$0xff]  ;;  %v57_v40 = vld [vmem:[#allocation5 + $0x58] sm:$0xff] }
  0x28   :  { %385 = vmatprep.subr.mxu1 %v129_v25  ;;  %315 = vmatpush1.msra.mxu0 %v64_v26  ;;  %v121_v41 = vld [vmem:[#allocation5 + $0x258] sm:$0xff]  ;;  %v56_v42 = vld [vmem:[#allocation5 + $0x50] sm:$0xff]  ;;  %v55_v44 = vld [vmem:[#allocation5 + $0x48] sm:$0xff] }
  0x29   :  { %386 = vmatpush1.msra.mxu1 %v128_v27  ;;  %316 = vmatprep.subr.mxu0 %v63_v28  ;;  %v120_v43 = vld [vmem:[#allocation5 + $0x250] sm:$0xff]  ;;  %v119_v45 = vld [vmem:[#allocation5 + $0x248] sm:$0xff]  ;;  %v54_v46 = vld [vmem:[#allocation5 + $0x40] sm:$0xff] }
  0x2a   :  { %387 = vmatprep.subr.mxu1 %v127_v29  ;;  %317 = vmatpush1.msra.mxu0 %v62_v30  ;;  %v118_v47 = vld [vmem:[#allocation5 + $0x240] sm:$0xff]  ;;  %v53_v48 = vld [vmem:[#allocation5 + $0x38] sm:$0xff]  ;;  %v52_v50 = vld [vmem:[#allocation5 + $0x30] sm:$0xff] }
  0x2b   :  { %388 = vmatpush1.msra.mxu1 %v126_v31  ;;  %318 = vmatprep.subr.mxu0 %v61_v32  ;;  %v117_v49 = vld [vmem:[#allocation5 + $0x238] sm:$0xff]  ;;  %v116_v51 = vld [vmem:[#allocation5 + $0x230] sm:$0xff]  ;;  %v51_v52 = vld [vmem:[#allocation5 + $0x28] sm:$0xff] }
  0x2c   :  { %389 = vmatprep.subr.mxu1 %v125_v33  ;;  %319 = vmatpush1.msra.mxu0 %v60_v34  ;;  %v115_v53 = vld [vmem:[#allocation5 + $0x228] sm:$0xff]  ;;  %v50_v54 = vld [vmem:[#allocation5 + $0x20] sm:$0xff]  ;;  %v49_v56 = vld [vmem:[#allocation5 + $0x18] sm:$0xff] }
  0x2d   :  { %390 = vmatpush1.msra.mxu1 %v124_v35  ;;  %320 = vmatprep.subr.mxu0 %v59_v36  ;;  %v114_v55 = vld [vmem:[#allocation5 + $0x220] sm:$0xff]  ;;  %v113_v57 = vld [vmem:[#allocation5 + $0x218] sm:$0xff]  ;;  %v48_v58 = vld [vmem:[#allocation5 + $0x10] sm:$0xff] }
  0x2e   :  { %391 = vmatprep.subr.mxu1 %v123_v37  ;;  %321 = vmatpush1.msra.mxu0 %v58_v38  ;;  %v112_v59 = vld [vmem:[#allocation5 + $0x210] sm:$0xff]  ;;  %v47_v60 = vld [vmem:[#allocation5 + $0x8] sm:$0xff]  ;;  %v46_v62 = vld [vmem:[#allocation5] sm:$0xff] }
  0x2f   :  { %392 = vmatpush1.msra.mxu1 %v122_v39  ;;  %322 = vmatprep.subr.mxu0 %v57_v40  ;;  %v111_v61 = vld [vmem:[#allocation5 + $0x208] sm:$0xff]  ;;  %v110_v63 = vld [vmem:[#allocation5 + $0x200] sm:$0xff]  ;;  %v109_v0 = vld [vmem:[#allocation5 + $0x1f8] sm:$0xff] }
  0x30   :  { %393 = vmatprep.subr.mxu1 %v121_v41  ;;  %323 = vmatpush1.msra.mxu0 %v56_v42  ;;  %v173_v1 = vld [vmem:[#allocation5 + $0x3f8] sm:$0xff]  ;;  %v108_v2 = vld [vmem:[#allocation5 + $0x1f0] sm:$0xff]  ;;  %v107_v4 = vld [vmem:[#allocation5 + $0x1e8] sm:$0xff] }
  0x31   :  { %394 = vmatpush1.msra.mxu1 %v120_v43  ;;  %324 = vmatprep.subr.mxu0 %v55_v44  ;;  %v172_v3 = vld [vmem:[#allocation5 + $0x3f0] sm:$0xff]  ;;  %v171_v5 = vld [vmem:[#allocation5 + $0x3e8] sm:$0xff]  ;;  %v106_v6 = vld [vmem:[#allocation5 + $0x1e0] sm:$0xff] }
  0x32   :  { %395 = vmatprep.subr.mxu1 %v119_v45  ;;  %325 = vmatpush1.msra.mxu0 %v54_v46  ;;  %v170_v7 = vld [vmem:[#allocation5 + $0x3e0] sm:$0xff]  ;;  %v105_v8 = vld [vmem:[#allocation5 + $0x1d8] sm:$0xff]  ;;  %v104_v10 = vld [vmem:[#allocation5 + $0x1d0] sm:$0xff] }
  0x33   :  { %396 = vmatpush1.msra.mxu1 %v118_v47  ;;  %326 = vmatprep.subr.mxu0 %v53_v48  ;;  %v169_v9 = vld [vmem:[#allocation5 + $0x3d8] sm:$0xff]  ;;  %v168_v11 = vld [vmem:[#allocation5 + $0x3d0] sm:$0xff]  ;;  %v103_v12 = vld [vmem:[#allocation5 + $0x1c8] sm:$0xff] }
  0x34   :  { %397 = vmatprep.subr.mxu1 %v117_v49  ;;  %327 = vmatpush1.msra.mxu0 %v52_v50  ;;  %v167_v13 = vld [vmem:[#allocation5 + $0x3c8] sm:$0xff]  ;;  %v102_v14 = vld [vmem:[#allocation5 + $0x1c0] sm:$0xff]  ;;  %v101_v16 = vld [vmem:[#allocation5 + $0x1b8] sm:$0xff] }
  0x35   :  { %398 = vmatpush1.msra.mxu1 %v116_v51  ;;  %328 = vmatprep.subr.mxu0 %v51_v52  ;;  %v166_v15 = vld [vmem:[#allocation5 + $0x3c0] sm:$0xff]  ;;  %v165_v17 = vld [vmem:[#allocation5 + $0x3b8] sm:$0xff]  ;;  %v100_v18 = vld [vmem:[#allocation5 + $0x1b0] sm:$0xff] }
  0x36   :  { %399 = vmatprep.subr.mxu1 %v115_v53  ;;  %329 = vmatpush1.msra.mxu0 %v50_v54  ;;  %v164_v19 = vld [vmem:[#allocation5 + $0x3b0] sm:$0xff]  ;;  %v99_v20 = vld [vmem:[#allocation5 + $0x1a8] sm:$0xff]  ;;  %v98_v22 = vld [vmem:[#allocation5 + $0x1a0] sm:$0xff] }
  0x37   :  { %400 = vmatpush1.msra.mxu1 %v114_v55  ;;  %330 = vmatprep.subr.mxu0 %v49_v56  ;;  %v163_v21 = vld [vmem:[#allocation5 + $0x3a8] sm:$0xff]  ;;  %v162_v23 = vld [vmem:[#allocation5 + $0x3a0] sm:$0xff]  ;;  %v97_v24 = vld [vmem:[#allocation5 + $0x198] sm:$0xff] }
  0x38   :  { %401 = vmatprep.subr.mxu1 %v113_v57  ;;  %331 = vmatpush1.msra.mxu0 %v48_v58  ;;  %v161_v25 = vld [vmem:[#allocation5 + $0x398] sm:$0xff]  ;;  %v96_v26 = vld [vmem:[#allocation5 + $0x190] sm:$0xff]  ;;  %v95_v28 = vld [vmem:[#allocation5 + $0x188] sm:$0xff] }
  0x39   :  { %402 = vmatpush1.msra.mxu1 %v112_v59  ;;  %332 = vmatprep.subr.mxu0 %v47_v60  ;;  %v160_v27 = vld [vmem:[#allocation5 + $0x390] sm:$0xff]  ;;  %v159_v29 = vld [vmem:[#allocation5 + $0x388] sm:$0xff]  ;;  %v94_v30 = vld [vmem:[#allocation5 + $0x180] sm:$0xff] }
  0x3a   :  { %403 = vmatprep.subr.mxu1 %v111_v61  ;;  %333 = vmatpush1.msra.mxu0 %v46_v62  ;;  %v158_v31 = vld [vmem:[#allocation5 + $0x380] sm:$0xff]  ;;  %v93_v32 = vld [vmem:[#allocation5 + $0x178] sm:$0xff]  ;;  %v92_v34 = vld [vmem:[#allocation5 + $0x170] sm:$0xff] }
  0x3b   :  { %404 = vmatpush1.msra.mxu1 %v110_v63  ;;  %334 = vmatprep.subr.mxu0 %v109_v0  ;;  %v157_v33 = vld [vmem:[#allocation5 + $0x378] sm:$0xff]  ;;  %v156_v35 = vld [vmem:[#allocation5 + $0x370] sm:$0xff]  ;;  %v91_v36 = vld [vmem:[#allocation5 + $0x168] sm:$0xff] }
  0x3c   :  { %405 = vmatprep.subr.mxu1 %v173_v1  ;;  %335 = vmatpush2.msra.mxu0 %v108_v2  ;;  %v155_v37 = vld [vmem:[#allocation5 + $0x368] sm:$0xff]  ;;  %v90_v38 = vld [vmem:[#allocation5 + $0x160] sm:$0xff]  ;;  %v89_v40 = vld [vmem:[#allocation5 + $0x158] sm:$0xff] }
  0x3d   :  { %406 = vmatpush2.msra.mxu1 %v172_v3  ;;  %336 = vmatprep.subr.mxu0 %v107_v4  ;;  %v154_v39 = vld [vmem:[#allocation5 + $0x360] sm:$0xff]  ;;  %v153_v41 = vld [vmem:[#allocation5 + $0x358] sm:$0xff]  ;;  %v88_v42 = vld [vmem:[#allocation5 + $0x150] sm:$0xff] }
  0x3e   :  { %407 = vmatprep.subr.mxu1 %v171_v5  ;;  %337 = vmatpush2.msra.mxu0 %v106_v6  ;;  %v152_v43 = vld [vmem:[#allocation5 + $0x350] sm:$0xff]  ;;  %v87_v44 = vld [vmem:[#allocation5 + $0x148] sm:$0xff]  ;;  %v86_v46 = vld [vmem:[#allocation5 + $0x140] sm:$0xff] }
  0x3f   :  { %408 = vmatpush2.msra.mxu1 %v170_v7  ;;  %338 = vmatprep.subr.mxu0 %v105_v8  ;;  %v151_v45 = vld [vmem:[#allocation5 + $0x348] sm:$0xff]  ;;  %v150_v47 = vld [vmem:[#allocation5 + $0x340] sm:$0xff]  ;;  %v85_v48 = vld [vmem:[#allocation5 + $0x138] sm:$0xff] }
  0x40   :  { %409 = vmatprep.subr.mxu1 %v169_v9  ;;  %339 = vmatpush2.msra.mxu0 %v104_v10  ;;  %v149_v49 = vld [vmem:[#allocation5 + $0x338] sm:$0xff]  ;;  %v84_v50 = vld [vmem:[#allocation5 + $0x130] sm:$0xff]  ;;  %v83_v52 = vld [vmem:[#allocation5 + $0x128] sm:$0xff] }
  0x41   :  { %410 = vmatpush2.msra.mxu1 %v168_v11  ;;  %340 = vmatprep.subr.mxu0 %v103_v12  ;;  %v148_v51 = vld [vmem:[#allocation5 + $0x330] sm:$0xff]  ;;  %v147_v53 = vld [vmem:[#allocation5 + $0x328] sm:$0xff]  ;;  %v82_v54 = vld [vmem:[#allocation5 + $0x120] sm:$0xff] }
  0x42   :  { %411 = vmatprep.subr.mxu1 %v167_v13  ;;  %341 = vmatpush2.msra.mxu0 %v102_v14  ;;  %v146_v55 = vld [vmem:[#allocation5 + $0x320] sm:$0xff]  ;;  %v81_v56 = vld [vmem:[#allocation5 + $0x118] sm:$0xff]  ;;  %v80_v58 = vld [vmem:[#allocation5 + $0x110] sm:$0xff] }
  0x43   :  { %412 = vmatpush2.msra.mxu1 %v166_v15  ;;  %342 = vmatprep.subr.mxu0 %v101_v16  ;;  %v145_v57 = vld [vmem:[#allocation5 + $0x318] sm:$0xff]  ;;  %v144_v59 = vld [vmem:[#allocation5 + $0x310] sm:$0xff]  ;;  %v79_v60 = vld [vmem:[#allocation5 + $0x108] sm:$0xff] }
  0x44   :  { %413 = vmatprep.subr.mxu1 %v165_v17  ;;  %343 = vmatpush2.msra.mxu0 %v100_v18  ;;  %v143_v61 = vld [vmem:[#allocation5 + $0x308] sm:$0xff]  ;;  %v78_v62 = vld [vmem:[#allocation5 + $0x100] sm:$0xff]  ;;  %v41_v1 = vld [vmem:[#allocation2 + $0x18] sm:$0xff] }
  0x45   :  { %414 = vmatpush2.msra.mxu1 %v164_v19  ;;  %344 = vmatprep.subr.mxu0 %v99_v20  ;;  %v39_v63 = vld [vmem:[#allocation2 + $0x8] sm:$0xff]  ;;  %v142_v0 = vld [vmem:[#allocation5 + $0x300] sm:$0xff]  ;;  %v40_v3 = vld [vmem:[#allocation2 + $0x10] sm:$0xff] }
  0x46   :  { %415 = vmatprep.subr.mxu1 %v163_v21  ;;  %345 = vmatpush2.msra.mxu0 %v98_v22  ;;  %v38_v2 = vld [vmem:[#allocation2] sm:$0xff]  ;;  %v205_v4 = vld [vmem:[#allocation5 + $0x4f8] sm:$0xff]  ;;  %v204_v6 = vld [vmem:[#allocation5 + $0x4f0] sm:$0xff] }
  0x47   :  { %416 = vmatpush2.msra.mxu1 %v162_v23  ;;  %346 = vmatprep.subr.mxu0 %v97_v24  ;;  %v269_v5 = vld [vmem:[#allocation5 + $0x6f8] sm:$0xff]  ;;  %v268_v7 = vld [vmem:[#allocation5 + $0x6f0] sm:$0xff]  ;;  %v203_v8 = vld [vmem:[#allocation5 + $0x4e8] sm:$0xff] }
  0x48   :  { %417 = vmatprep.subr.mxu1 %v161_v25  ;;  %347 = vmatpush2.msra.mxu0 %v96_v26  ;;  %v267_v9 = vld [vmem:[#allocation5 + $0x6e8] sm:$0xff]  ;;  %v202_v10 = vld [vmem:[#allocation5 + $0x4e0] sm:$0xff]  ;;  %v201_v12 = vld [vmem:[#allocation5 + $0x4d8] sm:$0xff] }
  0x49   :  { %418 = vmatpush2.msra.mxu1 %v160_v27  ;;  %348 = vmatprep.subr.mxu0 %v95_v28  ;;  %v266_v11 = vld [vmem:[#allocation5 + $0x6e0] sm:$0xff]  ;;  %v265_v13 = vld [vmem:[#allocation5 + $0x6d8] sm:$0xff]  ;;  %v200_v14 = vld [vmem:[#allocation5 + $0x4d0] sm:$0xff] }
  0x4a   :  { %419 = vmatprep.subr.mxu1 %v159_v29  ;;  %349 = vmatpush2.msra.mxu0 %v94_v30  ;;  %v264_v15 = vld [vmem:[#allocation5 + $0x6d0] sm:$0xff]  ;;  %v199_v16 = vld [vmem:[#allocation5 + $0x4c8] sm:$0xff]  ;;  %v198_v18 = vld [vmem:[#allocation5 + $0x4c0] sm:$0xff] }
  0x4b   :  { %420 = vmatpush2.msra.mxu1 %v158_v31  ;;  %350 = vmatprep.subr.mxu0 %v93_v32  ;;  %v263_v17 = vld [vmem:[#allocation5 + $0x6c8] sm:$0xff]  ;;  %v262_v19 = vld [vmem:[#allocation5 + $0x6c0] sm:$0xff]  ;;  %v197_v20 = vld [vmem:[#allocation5 + $0x4b8] sm:$0xff] }
  0x4c   :  { %421 = vmatprep.subr.mxu1 %v157_v33  ;;  %351 = vmatpush2.msra.mxu0 %v92_v34  ;;  %v261_v21 = vld [vmem:[#allocation5 + $0x6b8] sm:$0xff]  ;;  %v196_v22 = vld [vmem:[#allocation5 + $0x4b0] sm:$0xff]  ;;  %v195_v24 = vld [vmem:[#allocation5 + $0x4a8] sm:$0xff] }
  0x4d   :  { %422 = vmatpush2.msra.mxu1 %v156_v35  ;;  %352 = vmatprep.subr.mxu0 %v91_v36  ;;  %v260_v23 = vld [vmem:[#allocation5 + $0x6b0] sm:$0xff]  ;;  %v259_v25 = vld [vmem:[#allocation5 + $0x6a8] sm:$0xff]  ;;  %v194_v26 = vld [vmem:[#allocation5 + $0x4a0] sm:$0xff] }
  0x4e   :  { %423 = vmatprep.subr.mxu1 %v155_v37  ;;  %353 = vmatpush2.msra.mxu0 %v90_v38  ;;  %v258_v27 = vld [vmem:[#allocation5 + $0x6a0] sm:$0xff]  ;;  %v193_v28 = vld [vmem:[#allocation5 + $0x498] sm:$0xff]  ;;  %v192_v30 = vld [vmem:[#allocation5 + $0x490] sm:$0xff] }
  0x4f   :  { %424 = vmatpush2.msra.mxu1 %v154_v39  ;;  %354 = vmatprep.subr.mxu0 %v89_v40  ;;  %v257_v29 = vld [vmem:[#allocation5 + $0x698] sm:$0xff]  ;;  %v256_v31 = vld [vmem:[#allocation5 + $0x690] sm:$0xff]  ;;  %v191_v32 = vld [vmem:[#allocation5 + $0x488] sm:$0xff] }
  0x50   :  { %425 = vmatprep.subr.mxu1 %v153_v41  ;;  %355 = vmatpush2.msra.mxu0 %v88_v42  ;;  %v255_v33 = vld [vmem:[#allocation5 + $0x688] sm:$0xff]  ;;  %v190_v34 = vld [vmem:[#allocation5 + $0x480] sm:$0xff]  ;;  %v189_v36 = vld [vmem:[#allocation5 + $0x478] sm:$0xff] }
  0x51   :  { %426 = vmatpush2.msra.mxu1 %v152_v43  ;;  %356 = vmatprep.subr.mxu0 %v87_v44  ;;  %v254_v35 = vld [vmem:[#allocation5 + $0x680] sm:$0xff]  ;;  %v253_v37 = vld [vmem:[#allocation5 + $0x678] sm:$0xff]  ;;  %v188_v38 = vld [vmem:[#allocation5 + $0x470] sm:$0xff] }
  0x52   :  { %427 = vmatprep.subr.mxu1 %v151_v45  ;;  %357 = vmatpush2.msra.mxu0 %v86_v46  ;;  %v252_v39 = vld [vmem:[#allocation5 + $0x670] sm:$0xff]  ;;  %v187_v40 = vld [vmem:[#allocation5 + $0x468] sm:$0xff]  ;;  %v186_v42 = vld [vmem:[#allocation5 + $0x460] sm:$0xff] }
  0x53   :  { %428 = vmatpush2.msra.mxu1 %v150_v47  ;;  %358 = vmatprep.subr.mxu0 %v85_v48  ;;  %v251_v41 = vld [vmem:[#allocation5 + $0x668] sm:$0xff]  ;;  %v250_v43 = vld [vmem:[#allocation5 + $0x660] sm:$0xff]  ;;  %v185_v44 = vld [vmem:[#allocation5 + $0x458] sm:$0xff] }
  0x54   :  { %429 = vmatprep.subr.mxu1 %v149_v49  ;;  %359 = vmatpush2.msra.mxu0 %v84_v50  ;;  %v249_v45 = vld [vmem:[#allocation5 + $0x658] sm:$0xff]  ;;  %v184_v46 = vld [vmem:[#allocation5 + $0x450] sm:$0xff]  ;;  %v183_v48 = vld [vmem:[#allocation5 + $0x448] sm:$0xff] }
  0x55   :  { %430 = vmatpush2.msra.mxu1 %v148_v51  ;;  %360 = vmatprep.subr.mxu0 %v83_v52  ;;  %v248_v47 = vld [vmem:[#allocation5 + $0x650] sm:$0xff]  ;;  %v247_v49 = vld [vmem:[#allocation5 + $0x648] sm:$0xff]  ;;  %v182_v50 = vld [vmem:[#allocation5 + $0x440] sm:$0xff] }
  0x56   :  { %431 = vmatprep.subr.mxu1 %v147_v53  ;;  %361 = vmatpush2.msra.mxu0 %v82_v54  ;;  %v246_v51 = vld [vmem:[#allocation5 + $0x640] sm:$0xff]  ;;  %v181_v52 = vld [vmem:[#allocation5 + $0x438] sm:$0xff]  ;;  %v180_v54 = vld [vmem:[#allocation5 + $0x430] sm:$0xff] }
  0x57   :  { %432 = vmatpush2.msra.mxu1 %v146_v55  ;;  %362 = vmatprep.subr.mxu0 %v81_v56  ;;  %v245_v53 = vld [vmem:[#allocation5 + $0x638] sm:$0xff]  ;;  %v244_v55 = vld [vmem:[#allocation5 + $0x630] sm:$0xff]  ;;  %v179_v56 = vld [vmem:[#allocation5 + $0x428] sm:$0xff] }
  0x58   :  { %433 = vmatprep.subr.mxu1 %v145_v57  ;;  %363 = vmatpush2.msra.mxu0 %v80_v58  ;;  %v243_v57 = vld [vmem:[#allocation5 + $0x628] sm:$0xff]  ;;  %v178_v58 = vld [vmem:[#allocation5 + $0x420] sm:$0xff] }
  0x59   :  { %434 = vmatpush2.msra.mxu1 %v144_v59  ;;  %364 = vmatprep.subr.mxu0 %v79_v60  ;;  %v242_v59 = vld [vmem:[#allocation5 + $0x620] sm:$0xff]  ;;  %v177_v60 = vld [vmem:[#allocation5 + $0x418] sm:$0xff] }
  0x5a   :  { %435 = vmatprep.subr.mxu1 %v143_v61  ;;  %365 = vmatpush2.msra.mxu0 %v78_v62  ;;  %v241_v61 = vld [vmem:[#allocation5 + $0x618] sm:$0xff]  ;;  %v176_v62 = vld [vmem:[#allocation5 + $0x410] sm:$0xff] }
  0x5b   :  { %366 = vmatprep.mubr.f32.mxu0 %v39_v63  ;;  %436 = vmatpush2.msra.mxu1 %v142_v0  ;;  %v240_v63 = vld [vmem:[#allocation5 + $0x610] sm:$0xff]  ;;  %v175_v0 = vld [vmem:[#allocation5 + $0x408] sm:$0xff] }
  0x5c   :  { %437 = vmatprep.mubr.f32.mxu1 %v41_v1  ;;  %367 = vmatmul.mubr.f32.vlgmr.msra.gmra.mxu0 %v38_v2  ;;  %v239_v1 = vld [vmem:[#allocation5 + $0x608] sm:$0xff]  ;;  %v174_v2 = vld [vmem:[#allocation5 + $0x400] sm:$0xff] }
  0x5d   :  { %438 = vmatmul.mubr.f32.vlgmr.msra.gmra.mxu1 %v40_v3  ;;  %444 = vmatprep.subr.mxu0 %v205_v4  ;;  %v238_v3 = vld [vmem:[#allocation5 + $0x600] sm:$0xff]  ;;  %v237_v4 = vld [vmem:[#allocation5 + $0x5f8] sm:$0xff] }
  0x5e   :  { %515 = vmatprep.subr.mxu1 %v269_v5  ;;  %445 = vmatpush1.msra.mxu0 %v204_v6  ;;  %v301_v5 = vld [vmem:[#allocation5 + $0x7f8] sm:$0xff]  ;;  %v236_v6 = vld [vmem:[#allocation5 + $0x5f0] sm:$0xff] }
  0x5f   :  { %516 = vmatpush1.msra.mxu1 %v268_v7  ;;  %446 = vmatprep.subr.mxu0 %v203_v8  ;;  %v300_v7 = vld [vmem:[#allocation5 + $0x7f0] sm:$0xff]  ;;  %v235_v8 = vld [vmem:[#allocation5 + $0x5e8] sm:$0xff] }
  0x60   :  { %517 = vmatprep.subr.mxu1 %v267_v9  ;;  %447 = vmatpush1.msra.mxu0 %v202_v10  ;;  %v299_v9 = vld [vmem:[#allocation5 + $0x7e8] sm:$0xff]  ;;  %v234_v10 = vld [vmem:[#allocation5 + $0x5e0] sm:$0xff] }
  0x61   :  { %518 = vmatpush1.msra.mxu1 %v266_v11  ;;  %448 = vmatprep.subr.mxu0 %v201_v12  ;;  %v298_v11 = vld [vmem:[#allocation5 + $0x7e0] sm:$0xff]  ;;  %v233_v12 = vld [vmem:[#allocation5 + $0x5d8] sm:$0xff] }
  0x62   :  { %519 = vmatprep.subr.mxu1 %v265_v13  ;;  %449 = vmatpush1.msra.mxu0 %v200_v14  ;;  %v297_v13 = vld [vmem:[#allocation5 + $0x7d8] sm:$0xff]  ;;  %v232_v14 = vld [vmem:[#allocation5 + $0x5d0] sm:$0xff] }
  0x63   :  { %520 = vmatpush1.msra.mxu1 %v264_v15  ;;  %450 = vmatprep.subr.mxu0 %v199_v16  ;;  %v296_v15 = vld [vmem:[#allocation5 + $0x7d0] sm:$0xff]  ;;  %v231_v16 = vld [vmem:[#allocation5 + $0x5c8] sm:$0xff] }
  0x64   :  { %521 = vmatprep.subr.mxu1 %v263_v17  ;;  %451 = vmatpush1.msra.mxu0 %v198_v18  ;;  %v295_v17 = vld [vmem:[#allocation5 + $0x7c8] sm:$0xff]  ;;  %v230_v18 = vld [vmem:[#allocation5 + $0x5c0] sm:$0xff] }
  0x65   :  { %522 = vmatpush1.msra.mxu1 %v262_v19  ;;  %452 = vmatprep.subr.mxu0 %v197_v20  ;;  %v294_v19 = vld [vmem:[#allocation5 + $0x7c0] sm:$0xff]  ;;  %v229_v20 = vld [vmem:[#allocation5 + $0x5b8] sm:$0xff] }
  0x66   :  { %523 = vmatprep.subr.mxu1 %v261_v21  ;;  %453 = vmatpush1.msra.mxu0 %v196_v22  ;;  %v293_v21 = vld [vmem:[#allocation5 + $0x7b8] sm:$0xff]  ;;  %v228_v22 = vld [vmem:[#allocation5 + $0x5b0] sm:$0xff] }
  0x67   :  { %524 = vmatpush1.msra.mxu1 %v260_v23  ;;  %454 = vmatprep.subr.mxu0 %v195_v24  ;;  %v292_v23 = vld [vmem:[#allocation5 + $0x7b0] sm:$0xff]  ;;  %v227_v24 = vld [vmem:[#allocation5 + $0x5a8] sm:$0xff] }
  0x68   :  { %525 = vmatprep.subr.mxu1 %v259_v25  ;;  %455 = vmatpush1.msra.mxu0 %v194_v26  ;;  %v291_v25 = vld [vmem:[#allocation5 + $0x7a8] sm:$0xff]  ;;  %v226_v26 = vld [vmem:[#allocation5 + $0x5a0] sm:$0xff] }
  0x69   :  { %526 = vmatpush1.msra.mxu1 %v258_v27  ;;  %456 = vmatprep.subr.mxu0 %v193_v28  ;;  %v290_v27 = vld [vmem:[#allocation5 + $0x7a0] sm:$0xff]  ;;  %v225_v28 = vld [vmem:[#allocation5 + $0x598] sm:$0xff] }
  0x6a   :  { %527 = vmatprep.subr.mxu1 %v257_v29  ;;  %457 = vmatpush1.msra.mxu0 %v192_v30  ;;  %v289_v29 = vld [vmem:[#allocation5 + $0x798] sm:$0xff]  ;;  %v224_v30 = vld [vmem:[#allocation5 + $0x590] sm:$0xff] }
  0x6b   :  { %528 = vmatpush1.msra.mxu1 %v256_v31  ;;  %458 = vmatprep.subr.mxu0 %v191_v32  ;;  %v288_v31 = vld [vmem:[#allocation5 + $0x790] sm:$0xff]  ;;  %v223_v32 = vld [vmem:[#allocation5 + $0x588] sm:$0xff] }
  0x6c   :  { %529 = vmatprep.subr.mxu1 %v255_v33  ;;  %459 = vmatpush1.msra.mxu0 %v190_v34  ;;  %v287_v33 = vld [vmem:[#allocation5 + $0x788] sm:$0xff]  ;;  %v222_v34 = vld [vmem:[#allocation5 + $0x580] sm:$0xff] }
  0x6d   :  { %530 = vmatpush1.msra.mxu1 %v254_v35  ;;  %460 = vmatprep.subr.mxu0 %v189_v36  ;;  %v286_v35 = vld [vmem:[#allocation5 + $0x780] sm:$0xff]  ;;  %v221_v36 = vld [vmem:[#allocation5 + $0x578] sm:$0xff] }
  0x6e   :  { %531 = vmatprep.subr.mxu1 %v253_v37  ;;  %461 = vmatpush1.msra.mxu0 %v188_v38  ;;  %v285_v37 = vld [vmem:[#allocation5 + $0x778] sm:$0xff]  ;;  %v220_v38 = vld [vmem:[#allocation5 + $0x570] sm:$0xff] }
  0x6f   :  { %532 = vmatpush1.msra.mxu1 %v252_v39  ;;  %462 = vmatprep.subr.mxu0 %v187_v40  ;;  %v284_v39 = vld [vmem:[#allocation5 + $0x770] sm:$0xff]  ;;  %v219_v40 = vld [vmem:[#allocation5 + $0x568] sm:$0xff] }
  0x70   :  { %533 = vmatprep.subr.mxu1 %v251_v41  ;;  %463 = vmatpush1.msra.mxu0 %v186_v42  ;;  %v283_v41 = vld [vmem:[#allocation5 + $0x768] sm:$0xff]  ;;  %v218_v42 = vld [vmem:[#allocation5 + $0x560] sm:$0xff] }
  0x71   :  { %534 = vmatpush1.msra.mxu1 %v250_v43  ;;  %464 = vmatprep.subr.mxu0 %v185_v44  ;;  %v282_v43 = vld [vmem:[#allocation5 + $0x760] sm:$0xff]  ;;  %v217_v44 = vld [vmem:[#allocation5 + $0x558] sm:$0xff] }
  0x72   :  { %535 = vmatprep.subr.mxu1 %v249_v45  ;;  %465 = vmatpush1.msra.mxu0 %v184_v46  ;;  %v281_v45 = vld [vmem:[#allocation5 + $0x758] sm:$0xff]  ;;  %v216_v46 = vld [vmem:[#allocation5 + $0x550] sm:$0xff] }
  0x73   :  { %536 = vmatpush1.msra.mxu1 %v248_v47  ;;  %466 = vmatprep.subr.mxu0 %v183_v48  ;;  %v280_v47 = vld [vmem:[#allocation5 + $0x750] sm:$0xff]  ;;  %v215_v48 = vld [vmem:[#allocation5 + $0x548] sm:$0xff] }
  0x74   :  { %537 = vmatprep.subr.mxu1 %v247_v49  ;;  %467 = vmatpush1.msra.mxu0 %v182_v50  ;;  %v279_v49 = vld [vmem:[#allocation5 + $0x748] sm:$0xff]  ;;  %v214_v50 = vld [vmem:[#allocation5 + $0x540] sm:$0xff] }
  0x75   :  { %538 = vmatpush1.msra.mxu1 %v246_v51  ;;  %468 = vmatprep.subr.mxu0 %v181_v52  ;;  %v278_v51 = vld [vmem:[#allocation5 + $0x740] sm:$0xff]  ;;  %v213_v52 = vld [vmem:[#allocation5 + $0x538] sm:$0xff] }
  0x76   :  { %539 = vmatprep.subr.mxu1 %v245_v53  ;;  %469 = vmatpush1.msra.mxu0 %v180_v54  ;;  %v277_v53 = vld [vmem:[#allocation5 + $0x738] sm:$0xff]  ;;  %v212_v54 = vld [vmem:[#allocation5 + $0x530] sm:$0xff] }
  0x77   :  { %540 = vmatpush1.msra.mxu1 %v244_v55  ;;  %470 = vmatprep.subr.mxu0 %v179_v56  ;;  %v276_v55 = vld [vmem:[#allocation5 + $0x730] sm:$0xff]  ;;  %v211_v56 = vld [vmem:[#allocation5 + $0x528] sm:$0xff] }
  0x78   :  { %541 = vmatprep.subr.mxu1 %v243_v57  ;;  %471 = vmatpush1.msra.mxu0 %v178_v58  ;;  %v275_v57 = vld [vmem:[#allocation5 + $0x728] sm:$0xff]  ;;  %v210_v58 = vld [vmem:[#allocation5 + $0x520] sm:$0xff] }
  0x79   :  { %542 = vmatpush1.msra.mxu1 %v242_v59  ;;  %472 = vmatprep.subr.mxu0 %v177_v60  ;;  %v274_v59 = vld [vmem:[#allocation5 + $0x720] sm:$0xff]  ;;  %v209_v60 = vld [vmem:[#allocation5 + $0x518] sm:$0xff] }
  0x7a   :  { %543 = vmatprep.subr.mxu1 %v241_v61  ;;  %473 = vmatpush1.msra.mxu0 %v176_v62  ;;  %v273_v61 = vld [vmem:[#allocation5 + $0x718] sm:$0xff]  ;;  %v208_v62 = vld [vmem:[#allocation5 + $0x510] sm:$0xff] }
  0x7b   :  { %544 = vmatpush1.msra.mxu1 %v240_v63  ;;  %474 = vmatprep.subr.mxu0 %v175_v0  ;;  %v272_v63 = vld [vmem:[#allocation5 + $0x710] sm:$0xff]  ;;  %v207_v0 = vld [vmem:[#allocation5 + $0x508] sm:$0xff] }
  0x7c   :  { %545 = vmatprep.subr.mxu1 %v239_v1  ;;  %475 = vmatpush1.msra.mxu0 %v174_v2  ;;  %v271_v1 = vld [vmem:[#allocation5 + $0x708] sm:$0xff]  ;;  %v206_v2 = vld [vmem:[#allocation5 + $0x500] sm:$0xff] }
  0x7d   :  { %546 = vmatpush1.msra.mxu1 %v238_v3  ;;  %476 = vmatprep.subr.mxu0 %v237_v4  ;;  %v43_v3 = vld [vmem:[#allocation2 + $0x28] sm:$0xff]  ;;  %v270_v4 = vld [vmem:[#allocation5 + $0x700] sm:$0xff] }
  0x7e   :  { %547 = vmatprep.subr.mxu1 %v301_v5  ;;  %477 = vmatpush2.msra.mxu0 %v236_v6  ;;  %v45_v5 = vld [vmem:[#allocation2 + $0x38] sm:$0xff]  ;;  %v42_v6 = vld [vmem:[#allocation2 + $0x20] sm:$0xff] }
  0x7f   :  { %548 = vmatpush2.msra.mxu1 %v300_v7  ;;  %478 = vmatprep.subr.mxu0 %v235_v8  ;;  %v44_v7 = vld [vmem:[#allocation2 + $0x30] sm:$0xff] }
  0x80   :  { %549 = vmatprep.subr.mxu1 %v299_v9  ;;  %479 = vmatpush2.msra.mxu0 %v234_v10 }
  0x81   :  { %550 = vmatpush2.msra.mxu1 %v298_v11  ;;  %480 = vmatprep.subr.mxu0 %v233_v12 }
  0x82   :  { %551 = vmatprep.subr.mxu1 %v297_v13  ;;  %481 = vmatpush2.msra.mxu0 %v232_v14 }
  0x83   :  { %552 = vmatpush2.msra.mxu1 %v296_v15  ;;  %482 = vmatprep.subr.mxu0 %v231_v16 }
  0x84   :  { %553 = vmatprep.subr.mxu1 %v295_v17  ;;  %483 = vmatpush2.msra.mxu0 %v230_v18 }
  0x85   :  { %554 = vmatpush2.msra.mxu1 %v294_v19  ;;  %484 = vmatprep.subr.mxu0 %v229_v20 }
  0x86   :  { %555 = vmatprep.subr.mxu1 %v293_v21  ;;  %485 = vmatpush2.msra.mxu0 %v228_v22 }
  0x87   :  { %556 = vmatpush2.msra.mxu1 %v292_v23  ;;  %486 = vmatprep.subr.mxu0 %v227_v24 }
  0x88   :  { %557 = vmatprep.subr.mxu1 %v291_v25  ;;  %487 = vmatpush2.msra.mxu0 %v226_v26 }
  0x89   :  { %558 = vmatpush2.msra.mxu1 %v290_v27  ;;  %488 = vmatprep.subr.mxu0 %v225_v28 }
  0x8a   :  { %559 = vmatprep.subr.mxu1 %v289_v29  ;;  %489 = vmatpush2.msra.mxu0 %v224_v30 }
  0x8b   :  { %560 = vmatpush2.msra.mxu1 %v288_v31  ;;  %490 = vmatprep.subr.mxu0 %v223_v32 }
  0x8c   :  { %561 = vmatprep.subr.mxu1 %v287_v33  ;;  %491 = vmatpush2.msra.mxu0 %v222_v34 }
  0x8d   :  { %562 = vmatpush2.msra.mxu1 %v286_v35  ;;  %492 = vmatprep.subr.mxu0 %v221_v36 }
  0x8e   :  { %563 = vmatprep.subr.mxu1 %v285_v37  ;;  %493 = vmatpush2.msra.mxu0 %v220_v38 }
  0x8f   :  { %564 = vmatpush2.msra.mxu1 %v284_v39  ;;  %494 = vmatprep.subr.mxu0 %v219_v40 }
  0x90   :  { %565 = vmatprep.subr.mxu1 %v283_v41  ;;  %495 = vmatpush2.msra.mxu0 %v218_v42 }
  0x91   :  { %566 = vmatpush2.msra.mxu1 %v282_v43  ;;  %496 = vmatprep.subr.mxu0 %v217_v44 }
  0x92   :  { %567 = vmatprep.subr.mxu1 %v281_v45  ;;  %497 = vmatpush2.msra.mxu0 %v216_v46 }
  0x93   :  { %568 = vmatpush2.msra.mxu1 %v280_v47  ;;  %498 = vmatprep.subr.mxu0 %v215_v48 }
  0x94   :  { %569 = vmatprep.subr.mxu1 %v279_v49  ;;  %499 = vmatpush2.msra.mxu0 %v214_v50 }
  0x95   :  { %570 = vmatpush2.msra.mxu1 %v278_v51  ;;  %500 = vmatprep.subr.mxu0 %v213_v52 }
  0x96   :  { %571 = vmatprep.subr.mxu1 %v277_v53  ;;  %501 = vmatpush2.msra.mxu0 %v212_v54 }
  0x97   :  { %572 = vmatpush2.msra.mxu1 %v276_v55  ;;  %502 = vmatprep.subr.mxu0 %v211_v56 }
  0x98   :  { %573 = vmatprep.subr.mxu1 %v275_v57  ;;  %503 = vmatpush2.msra.mxu0 %v210_v58 }
  0x99   :  { %574 = vmatpush2.msra.mxu1 %v274_v59  ;;  %504 = vmatprep.subr.mxu0 %v209_v60 }
  0x9a   :  { %575 = vmatprep.subr.mxu1 %v273_v61  ;;  %505 = vmatpush2.msra.mxu0 %v208_v62 }
  0x9b   :  { %576 = vmatpush2.msra.mxu1 %v272_v63  ;;  %506 = vmatprep.subr.mxu0 %v207_v0 }
  0x9c   :  { %577 = vmatprep.subr.mxu1 %v271_v1  ;;  %507 = vmatpush2.msra.mxu0 %v206_v2 }
  0x9d   :  { %508 = vmatprep.mubr.f32.mxu0 %v43_v3  ;;  %578 = vmatpush2.msra.mxu1 %v270_v4 }
  0x9e   :  { %579 = vmatprep.mubr.f32.mxu1 %v45_v5  ;;  %509 = vmatmul.mubr.f32.vlgmr.msra.gmra.mxu0 %v42_v6 }
  0x9f   :  { %580 = vmatmul.mubr.f32.vlgmr.msra.gmra.mxu1 %v44_v7 }
 0x11c   :  { %v368_v8 = vpop.f32.mrf.mxu0 }
 0x11d   :  { %v439_v9 = vpop.f32.mrf.mxu1 }
 0x11e   :  { %v370_v10 = vpop.f32.mrf.mxu0  ;;  %v440_v12 = vadd.f32 %v439_v9, %v368_v8 }
 0x11f   :  { %v441_v11 = vpop.f32.mrf.mxu1 }
 0x120   :  { %v442_v15 = vadd.f32 %v441_v11, %v370_v10 }
 0x15e   :  { %v510_v13 = vpop.f32.mrf.mxu0 }
 0x15f   :  { %v581_v14 = vpop.f32.mrf.mxu1  ;;  %v511_v16 = vadd.f32 %v510_v13, %v440_v12 }
 0x160   :  { %v512_v17 = vpop.f32.mrf.mxu0 }
 0x161   :  { %v582_v18 = vadd.f32 %v581_v14, %v511_v16  ;;  %v513_v19 = vadd.f32 %v512_v17, %v442_v15  ;;  %v583_v20 = vpop.f32.mrf.mxu1 }
 0x163   :  { %v586_v21 = vmul.f32 63.75, %v582_v18  ;;  %v584_v22 = vadd.f32 %v583_v20, %v513_v19 }
 0x165   :  { %v613_v23 = vcvt.f32.s32 %v586_v21  ;;  %v587_v24 = vmul.f32 63.75, %v584_v22  ;;  %v611_v27 = vand.u32 2147483647, %v586_v21  ;;  %v616_v29 = vand.u32 2147483648, %v586_v21 }
 0x167   :  { %v614_v25 = vcvt.s32.f32 %v613_v23  ;;  %v621_v26 = vcvt.f32.s32 %v587_v24  ;;  %v619_v31 = vand.u32 2147483647, %v587_v24  ;;  %v624_v33 = vand.u32 2147483648, %v587_v24 }
 0x168   :  { %vm612_vm0 = vcmp.lt.f32.partialorder %v611_v27, 8388608.0 }
 0x169   :  { %v615_v28 = vand.u32 2147483647, %v614_v25  ;;  %v622_v30 = vcvt.s32.f32 %v621_v26  ;;  %vm620_vm1 = vcmp.lt.f32.partialorder %v619_v31, 8388608.0 }
 0x16b   :  { %v623_v32 = vand.u32 2147483647, %v622_v30  ;;  %v617_v34 = vor.u32 %v616_v29, %v615_v28 }
 0x16d   :  { %v618_v35 = vsel %vm612_vm0, %v617_v34, %v586_v21  ;;  %v625_v36 = vor.u32 %v624_v33, %v623_v32 }
 0x16e   :  { %v591_v37 = vmul.f32 0.003921569, %v618_v35 }
 0x16f   :  { %v626_v38 = vsel %vm620_vm1, %v625_v36, %v587_v24 }
 0x170   :  { %v592_v39 = vmul.f32 0.003921569, %v626_v38  ;;  %593 = vst [vmem:[#allocation7] sm:$0xff] %v591_v37 }
 0x172   :  { %594 = vst [vmem:[#allocation7 + $0x8] sm:$0xff] %v592_v39 }
 0x173   :  { %683 = shalt.err (!%p680_p0)
}
 0x174   :  { %604 = dma.vmem_to_hbm [thread:$0]  %s602_s1, 256, %s729_s2, [#allocation4]  }
 0x175   :  { %696 = dma.done.wait [#allocation4], 256  }
 0x176   :  { %697 = vsyncadd [#allocation4], 4294967040 }
 0x177   :  { %608 = vsyncpa [#allocation3], 1 }
 0x178   :  { %609 = vsyncpa [#allocation6], 1 }
 0x179   :  { %610 = vsyncpa [#allocation4], 1 }

</bundles_post_ra>
